<compile_context>
chip_gen: v7x
topology: tpu7x:2x2x1
jax: 0.10.0
libtpu: 0.0.40
codegen_flags: <defaults>
</compile_context>

<pallas_src>
import functools

import jax
import jax.numpy as jnp
from jax.experimental import pallas as pl
from jax.experimental.pallas import tpu as pltpu


def _round_up(x, m):
    return ((x + m - 1) // m) * m


def _ce_label_smooth_kernel(logits_ref, targets_ref, loss_ref,
                            m_sc, l_sc, xt_sc, xsum_sc, *,
                            epsilon: float, num_classes: int,
                            class_tile: int, mask_tail: bool):
    j = pl.program_id(1)

    @pl.when(j == 0)
    def _():
        m_sc[...] = jnp.full_like(m_sc, -jnp.inf)
        l_sc[...] = jnp.zeros_like(l_sc)
        xt_sc[...] = jnp.zeros_like(xt_sc)
        xsum_sc[...] = jnp.zeros_like(xsum_sc)

    # (TB, TC) logits tile, cast to f32 at first use (v5e VPU/EUP have no bf16).
    x = logits_ref[...].astype(jnp.float32)
    t = targets_ref[...]                                          # (TB, 1) int32

    c_start = j * class_tile
    # (1, TC) class-id row, broadcast inside the compares (no (TB, TC) iota).
    col_ids = jax.lax.broadcasted_iota(jnp.int32, (1, class_tile), 1) + c_start

    if mask_tail:
        valid = col_ids < num_classes                             # (1, TC)
        x = jnp.where(valid, x, -jnp.inf)
        n_valid = jnp.minimum(num_classes - c_start,
                              class_tile).astype(jnp.float32)
    else:
        n_valid = float(class_tile)

    # Online (flash-style) logsumexp over the class axis.
    m_old = m_sc[...]                                             # (TB, 1)
    m_new = jnp.maximum(m_old, jnp.max(x, axis=1, keepdims=True))
    shifted = x - m_new                                           # (TB, TC)
    l_sc[...] = (jnp.exp(m_old - m_new) * l_sc[...]
                 + jnp.sum(jnp.exp(shifted), axis=1, keepdims=True))
    m_sc[...] = m_new

    # x at the target class (only the class tile containing the target hits).
    xt_sc[...] += jnp.sum(jnp.where(col_ids == t, x, 0.0),
                          axis=1, keepdims=True)

    # Running sum_j x_ij, reusing the already-materialized (x - m_new).
    if mask_tail:
        s = jnp.sum(jnp.where(valid, shifted, 0.0), axis=1, keepdims=True)
    else:
        s = jnp.sum(shifted, axis=1, keepdims=True)
    xsum_sc[...] += s + n_valid * m_new

    @pl.when(j == pl.num_programs(1) - 1)
    def _():
        lse = m_sc[...] + jnp.log(l_sc[...])
        loss_ref[...] = (lse
                         - (1.0 - epsilon) * xt_sc[...]
                         - (epsilon / num_classes) * xsum_sc[...])


def cross_entropy_label_smooth(logits, targets, *, num_classes,
                               epsilon=0.1, reduction=True, class_tile=None):
    """logits: (B, num_classes) float; targets: (B,) integer class indices."""
    B, C = logits.shape
    assert C == num_classes
    itemsize = int(jnp.dtype(logits.dtype).itemsize)

    # Generation-aware VMEM budget (v5e/v6e: 128 MiB/TC, v7x: 64 MiB/TC),
    # with ~30% headroom for compiler temporaries / pipelining slack.
    try:
        vmem_cap = int(getattr(pltpu.get_tpu_info(), "vmem_capacity_bytes",
                               64 * 1024 * 1024))
    except Exception:  # pragma: no cover - conservative fallback
        vmem_cap = 64 * 1024 * 1024
    budget = int(vmem_cap * 0.7)

    # Per-(tb, tc) tile working set: 2x double-buffered native-dtype input
    # plus ~4x f32 in-kernel temporaries (f32 cast, shifted, exp, selects).
    per_elem = 2 * itemsize + 4 * 4

    # Batch tile: multiple of 8 (f32 sublane), or the full batch when B <= 8.
    if B <= 8:
        tb = B
    else:
        tb = min(512, _round_up(B, 8))
        # v7x has 2 TensorCores: keep >= 2 batch-grid steps so both get work
        # under dimension_semantics=("parallel", ...). No-op on v5e/v6e.
        tb = min(tb, _round_up(-(-B // 2), 8))

    # Class tile: full row if it fits the budget, else a lane-dense multiple
    # of 128 walked by the inner "arbitrary" grid axis (online logsumexp).
    if class_tile is not None:
        tc = int(class_tile)
    elif tb * C * per_elem <= budget:
        tc = C
    else:
        tc = (budget // (tb * per_elem)) // 128 * 128
        tc = int(min(C, max(128, min(8192, tc))))
    mask_tail = (tc < C) and (C % tc != 0)

    grid = (pl.cdiv(B, tb), pl.cdiv(C, tc))

    targets_2d = targets.astype(jnp.int32).reshape(B, 1)

    kernel = functools.partial(_ce_label_smooth_kernel,
                               epsilon=float(epsilon),
                               num_classes=int(num_classes),
                               class_tile=int(tc),
                               mask_tail=bool(mask_tail))

    tile_bytes = tb * tc * per_elem
    vmem_limit = int(min(vmem_cap,
                         max(32 * 1024 * 1024, tile_bytes + (8 << 20))))

    cost = pl.CostEstimate(
        flops=9 * B * C,                 # max/sub/exp-sum/compares/selects/axpys
        transcendentals=B * C,           # exp per element (+ log per row)
        bytes_accessed=B * C * itemsize + B * 4 + B * 4,
    )

    per_sample = pl.pallas_call(
        kernel,
        out_shape=jax.ShapeDtypeStruct((B, 1), jnp.float32),
        grid_spec=pltpu.PrefetchScalarGridSpec(
            num_scalar_prefetch=0,
            grid=grid,
            in_specs=[
                pl.BlockSpec((tb, tc), lambda i, j: (i, j)),
                # Indexed only by the batch axis: stays resident across the
                # inner class-axis loop (one tiny DMA per batch block).
                pl.BlockSpec((tb, 1), lambda i, j: (i, 0)),
            ],
            out_specs=pl.BlockSpec((tb, 1), lambda i, j: (i, 0)),
            scratch_shapes=[
                pltpu.VMEM((tb, 1), jnp.float32),   # running max m
                pltpu.VMEM((tb, 1), jnp.float32),   # running sum exp(x - m)
                pltpu.VMEM((tb, 1), jnp.float32),   # running x[target]
                pltpu.VMEM((tb, 1), jnp.float32),   # running sum_j x
            ],
        ),
        compiler_params=pltpu.CompilerParams(
            dimension_semantics=("parallel", "arbitrary"),
            vmem_limit_bytes=vmem_limit,
        ),
        cost_estimate=cost,
    )(logits, targets_2d)

    # Ragged batch-tail rows (if B % tb != 0) contain garbage; they are
    # per-row independent and must be sliced off before the mean.
    loss = per_sample[:B, 0]
    return jnp.mean(loss) if reduction else loss


def _reference(logits, targets, num_classes, epsilon=0.1, reduction=True):
    log_probs = jax.nn.log_softmax(logits.astype(jnp.float32), axis=1)
    one_hot = jax.nn.one_hot(targets, num_classes, dtype=jnp.float32)
    smoothed = (1.0 - epsilon) * one_hot + epsilon / num_classes
    loss = jnp.sum(-smoothed * log_probs, axis=1)
    return jnp.mean(loss) if reduction else loss


if __name__ == "__main__":
    EPS = 0.1
    key = jax.random.PRNGKey(0)

    # Case 1: single class tile, mean + per-sample reductions.
    B, C = 8, 128
    k1, k2, key = jax.random.split(key, 3)
    logits = jax.random.normal(k1, (B, C), dtype=jnp.float32)
    targets = jax.random.randint(k2, (B,), 0, C, dtype=jnp.int32)
    loss = jax.block_until_ready(cross_entropy_label_smooth(
        logits, targets, num_classes=C, epsilon=EPS, reduction=True))
    loss_vec = jax.block_until_ready(cross_entropy_label_smooth(
        logits, targets, num_classes=C, epsilon=EPS, reduction=False))
    assert jnp.allclose(loss, _reference(logits, targets, C, EPS, True),
                        atol=1e-5, rtol=1e-5)
    assert jnp.allclose(loss_vec, _reference(logits, targets, C, EPS, False),
                        atol=1e-5, rtol=1e-5)

    # Case 2: ragged batch (B % tb != 0) -> un-padded cdiv grid path.
    B2, C2 = 13, 128
    k1, k2, key = jax.random.split(key, 3)
    logits2 = jax.random.normal(k1, (B2, C2), dtype=jnp.float32)
    targets2 = jax.random.randint(k2, (B2,), 0, C2, dtype=jnp.int32)
    out2 = jax.block_until_ready(cross_entropy_label_smooth(
        logits2, targets2, num_classes=C2, epsilon=EPS, reduction=False))
    assert jnp.allclose(out2, _reference(logits2, targets2, C2, EPS, False),
                        atol=1e-5, rtol=1e-5)

    # Case 3: forced class tiling (2 class-grid steps, online logsumexp).
    B3, C3 = 8, 256
    k1, k2, key = jax.random.split(key, 3)
    logits3 = jax.random.normal(k1, (B3, C3), dtype=jnp.float32)
    targets3 = jax.random.randint(k2, (B3,), 0, C3, dtype=jnp.int32)
    out3 = jax.block_until_ready(cross_entropy_label_smooth(
        logits3, targets3, num_classes=C3, epsilon=EPS, reduction=False,
        class_tile=128))
    assert jnp.allclose(out3, _reference(logits3, targets3, C3, EPS, False),
                        atol=1e-5, rtol=1e-5)

    # Case 4: class tiling with a ragged class tail (in-kernel mask path).
    B4, C4 = 8, 200
    k1, k2, key = jax.random.split(key, 3)
    logits4 = jax.random.normal(k1, (B4, C4), dtype=jnp.float32)
    targets4 = jax.random.randint(k2, (B4,), 0, C4, dtype=jnp.int32)
    out4 = jax.block_until_ready(cross_entropy_label_smooth(
        logits4, targets4, num_classes=C4, epsilon=EPS, reduction=False,
        class_tile=128))
    assert jnp.allclose(out4, _reference(logits4, targets4, C4, EPS, False),
                        atol=1e-5, rtol=1e-5)

    print("KERNEL_OK")
</pallas_src>

<mosaic_0001>
module attributes {stable_mosaic.version = 11 : i64} {
  func.func @_ce_label_smooth_kernel(%arg0: i32, %arg1: i32, %arg2: memref<8x128xf32, #tpu.memory_space<vmem>>, %arg3: memref<8x1xi32, #tpu.memory_space<vmem>>, %arg4: memref<8x1xf32, #tpu.memory_space<vmem>>, %arg5: memref<8x1xf32, #tpu.memory_space<vmem>>, %arg6: memref<8x1xf32, #tpu.memory_space<vmem>>, %arg7: memref<8x1xf32, #tpu.memory_space<vmem>>, %arg8: memref<8x1xf32, #tpu.memory_space<vmem>>) attributes {dimension_semantics = [#tpu.dimension_semantics<parallel>, #tpu.dimension_semantics<arbitrary>], iteration_bounds = array<i64: 1, 1>, scalar_prefetch = 0 : i64, scratch_operands = 4 : i64, tpu.core_type = #tpu.core_type<tc>, window_params = [{transform_indices = @transform_0, window_bounds = array<i64: 8, 128>}, {transform_indices = @transform_1, window_bounds = array<i64: 8, 1>}, {transform_indices = @transform_2, window_bounds = array<i64: 8, 1>}]} {
    %c0_i32 = arith.constant 0 : i32
    %0 = arith.cmpi eq, %arg1, %c0_i32 : i32
    %1 = arith.extui %0 : i1 to i32
    %c0_i32_0 = arith.constant 0 : i32
    %2 = arith.cmpi ne, %1, %c0_i32_0 : i32
    scf.if %2 {
      %cst_27 = arith.constant 0xFF800000 : f32
      %46 = vector.broadcast %cst_27 : f32 to vector<8x1xf32>
      %c0_28 = arith.constant 0 : index
      %c0_29 = arith.constant 0 : index
      %47 = vector.load %arg5[%c0_28, %c0_29] : memref<8x1xf32, #tpu.memory_space<vmem>>, vector<8x1xf32>
      tpu.vector_store %arg5[%c0_28, %c0_29], %46 {strides = array<i32>} : memref<8x1xf32, #tpu.memory_space<vmem>>, vector<8x1xf32>,
      %cst_30 = arith.constant 0.000000e+00 : f32
      %48 = vector.broadcast %cst_30 : f32 to vector<8x1xf32>
      %c0_31 = arith.constant 0 : index
      %c0_32 = arith.constant 0 : index
      %49 = vector.load %arg6[%c0_31, %c0_32] : memref<8x1xf32, #tpu.memory_space<vmem>>, vector<8x1xf32>
      tpu.vector_store %arg6[%c0_31, %c0_32], %48 {strides = array<i32>} : memref<8x1xf32, #tpu.memory_space<vmem>>, vector<8x1xf32>,
      %cst_33 = arith.constant 0.000000e+00 : f32
      %50 = vector.broadcast %cst_33 : f32 to vector<8x1xf32>
      %c0_34 = arith.constant 0 : index
      %c0_35 = arith.constant 0 : index
      %51 = vector.load %arg7[%c0_34, %c0_35] : memref<8x1xf32, #tpu.memory_space<vmem>>, vector<8x1xf32>
      tpu.vector_store %arg7[%c0_34, %c0_35], %50 {strides = array<i32>} : memref<8x1xf32, #tpu.memory_space<vmem>>, vector<8x1xf32>,
      %cst_36 = arith.constant 0.000000e+00 : f32
      %52 = vector.broadcast %cst_36 : f32 to vector<8x1xf32>
      %c0_37 = arith.constant 0 : index
      %c0_38 = arith.constant 0 : index
      %53 = vector.load %arg8[%c0_37, %c0_38] : memref<8x1xf32, #tpu.memory_space<vmem>>, vector<8x1xf32>
      tpu.vector_store %arg8[%c0_37, %c0_38], %52 {strides = array<i32>} : memref<8x1xf32, #tpu.memory_space<vmem>>, vector<8x1xf32>,
    } else {
    }
    %c0 = arith.constant 0 : index
    %c0_1 = arith.constant 0 : index
    %3 = vector.load %arg2[%c0, %c0_1] : memref<8x128xf32, #tpu.memory_space<vmem>>, vector<8x128xf32>
    %c0_2 = arith.constant 0 : index
    %c0_3 = arith.constant 0 : index
    %4 = vector.load %arg3[%c0_2, %c0_3] : memref<8x1xi32, #tpu.memory_space<vmem>>, vector<8x1xi32>
    %c128_i32 = arith.constant 128 : i32
    %5 = arith.muli %arg1, %c128_i32 : i32
    %6 = tpu.iota {dimensions = array<i32: 1>} : vector<1x128xi32>
    %7 = vector.broadcast %5 : i32 to vector<1x128xi32>
    %8 = arith.addi %6, %7 : vector<1x128xi32>
    %c0_4 = arith.constant 0 : index
    %c0_5 = arith.constant 0 : index
    %9 = vector.load %arg5[%c0_4, %c0_5] : memref<8x1xf32, #tpu.memory_space<vmem>>, vector<8x1xf32>
    %cst = arith.constant dense<0xFF800000> : vector<8xf32>
    %10 = vector.multi_reduction <maximumf>, %3, %cst [1] : vector<8x128xf32> to vector<8xf32>
    %11 = vector.shape_cast %10 : vector<8xf32> to vector<8x1xf32>
    %12 = arith.maximumf %9, %11 : vector<8x1xf32>
    %13 = vector.broadcast %12 : vector<8x1xf32> to vector<8x128xf32>
    %14 = arith.subf %3, %13 : vector<8x128xf32>
    %15 = arith.subf %9, %12 : vector<8x1xf32>
    %16 = math.exp %15 : vector<8x1xf32>
    %c0_6 = arith.constant 0 : index
    %c0_7 = arith.constant 0 : index
    %17 = vector.load %arg6[%c0_6, %c0_7] : memref<8x1xf32, #tpu.memory_space<vmem>>, vector<8x1xf32>
    %18 = arith.mulf %16, %17 : vector<8x1xf32>
    %19 = math.exp %14 : vector<8x128xf32>
    %cst_8 = arith.constant dense<0.000000e+00> : vector<8xf32>
    %20 = vector.multi_reduction <add>, %19, %cst_8 [1] : vector<8x128xf32> to vector<8xf32>
    %21 = vector.shape_cast %20 : vector<8xf32> to vector<8x1xf32>
    %22 = arith.addf %18, %21 : vector<8x1xf32>
    %c0_9 = arith.constant 0 : index
    %c0_10 = arith.constant 0 : index
    %23 = vector.load %arg6[%c0_9, %c0_10] : memref<8x1xf32, #tpu.memory_space<vmem>>, vector<8x1xf32>
    tpu.vector_store %arg6[%c0_9, %c0_10], %22 {strides = array<i32>} : memref<8x1xf32, #tpu.memory_space<vmem>>, vector<8x1xf32>,
    %c0_11 = arith.constant 0 : index
    %c0_12 = arith.constant 0 : index
    %24 = vector.load %arg5[%c0_11, %c0_12] : memref<8x1xf32, #tpu.memory_space<vmem>>, vector<8x1xf32>
    tpu.vector_store %arg5[%c0_11, %c0_12], %12 {strides = array<i32>} : memref<8x1xf32, #tpu.memory_space<vmem>>, vector<8x1xf32>,
    %c0_13 = arith.constant 0 : index
    %c0_14 = arith.constant 0 : index
    %25 = vector.load %arg7[%c0_13, %c0_14] : memref<8x1xf32, #tpu.memory_space<vmem>>, vector<8x1xf32>
    %26 = vector.broadcast %8 : vector<1x128xi32> to vector<8x128xi32>
    %27 = vector.broadcast %4 : vector<8x1xi32> to vector<8x128xi32>
    %28 = arith.cmpi eq, %26, %27 : vector<8x128xi32>
    %cst_15 = arith.constant 0.000000e+00 : f32
    %29 = vector.broadcast %cst_15 : f32 to vector<8x128xf32>
    %30 = arith.select %28, %3, %29 : vector<8x128xi1>, vector<8x128xf32>
    %cst_16 = arith.constant dense<0.000000e+00> : vector<8xf32>
    %31 = vector.multi_reduction <add>, %30, %cst_16 [1] : vector<8x128xf32> to vector<8xf32>
    %32 = vector.shape_cast %31 : vector<8xf32> to vector<8x1xf32>
    %33 = arith.addf %25, %32 : vector<8x1xf32>
    %c0_17 = arith.constant 0 : index
    %c0_18 = arith.constant 0 : index
    %34 = vector.load %arg7[%c0_17, %c0_18] : memref<8x1xf32, #tpu.memory_space<vmem>>, vector<8x1xf32>
    tpu.vector_store %arg7[%c0_17, %c0_18], %33 {strides = array<i32>} : memref<8x1xf32, #tpu.memory_space<vmem>>, vector<8x1xf32>,
    %cst_19 = arith.constant dense<0.000000e+00> : vector<8xf32>
    %35 = vector.multi_reduction <add>, %14, %cst_19 [1] : vector<8x128xf32> to vector<8xf32>
    %36 = vector.shape_cast %35 : vector<8xf32> to vector<8x1xf32>
    %c0_20 = arith.constant 0 : index
    %c0_21 = arith.constant 0 : index
    %37 = vector.load %arg8[%c0_20, %c0_21] : memref<8x1xf32, #tpu.memory_space<vmem>>, vector<8x1xf32>
    %cst_22 = arith.constant 1.280000e+02 : f32
    %38 = vector.broadcast %cst_22 : f32 to vector<8x1xf32>
    %39 = arith.mulf %38, %12 : vector<8x1xf32>
    %40 = arith.addf %36, %39 : vector<8x1xf32>
    %41 = arith.addf %37, %40 : vector<8x1xf32>
    %c0_23 = arith.constant 0 : index
    %c0_24 = arith.constant 0 : index
    %42 = vector.load %arg8[%c0_23, %c0_24] : memref<8x1xf32, #tpu.memory_space<vmem>>, vector<8x1xf32>
    tpu.vector_store %arg8[%c0_23, %c0_24], %41 {strides = array<i32>} : memref<8x1xf32, #tpu.memory_space<vmem>>, vector<8x1xf32>,
    %c0_i32_25 = arith.constant 0 : i32
    %43 = arith.cmpi eq, %arg1, %c0_i32_25 : i32
    %44 = arith.extui %43 : i1 to i32
    %c0_i32_26 = arith.constant 0 : i32
    %45 = arith.cmpi ne, %44, %c0_i32_26 : i32
    scf.if %45 {
      %c0_27 = arith.constant 0 : index
      %c0_28 = arith.constant 0 : index
      %46 = vector.load %arg5[%c0_27, %c0_28] : memref<8x1xf32, #tpu.memory_space<vmem>>, vector<8x1xf32>
      %c0_29 = arith.constant 0 : index
      %c0_30 = arith.constant 0 : index
      %47 = vector.load %arg6[%c0_29, %c0_30] : memref<8x1xf32, #tpu.memory_space<vmem>>, vector<8x1xf32>
      %48 = math.log %47 : vector<8x1xf32>
      %49 = arith.addf %46, %48 : vector<8x1xf32>
      %c0_31 = arith.constant 0 : index
      %c0_32 = arith.constant 0 : index
      %50 = vector.load %arg7[%c0_31, %c0_32] : memref<8x1xf32, #tpu.memory_space<vmem>>, vector<8x1xf32>
      %cst_33 = arith.constant 0.899999976 : f32
      %51 = vector.broadcast %cst_33 : f32 to vector<8x1xf32>
      %52 = arith.mulf %51, %50 : vector<8x1xf32>
      %53 = arith.subf %49, %52 : vector<8x1xf32>
      %c0_34 = arith.constant 0 : index
      %c0_35 = arith.constant 0 : index
      %54 = vector.load %arg8[%c0_34, %c0_35] : memref<8x1xf32, #tpu.memory_space<vmem>>, vector<8x1xf32>
      %cst_36 = arith.constant 7.812500e-04 : f32
      %55 = vector.broadcast %cst_36 : f32 to vector<8x1xf32>
      %56 = arith.mulf %55, %54 : vector<8x1xf32>
      %57 = arith.subf %53, %56 : vector<8x1xf32>
      %c0_37 = arith.constant 0 : index
      %c0_38 = arith.constant 0 : index
      %58 = vector.load %arg4[%c0_37, %c0_38] : memref<8x1xf32, #tpu.memory_space<vmem>>, vector<8x1xf32>
      tpu.vector_store %arg4[%c0_37, %c0_38], %57 {strides = array<i32>} : memref<8x1xf32, #tpu.memory_space<vmem>>, vector<8x1xf32>,
    } else {
    }
    return
  }
  func.func @transform_0(%arg0: i32, %arg1: i32) -> (i32, i32) {
    %c0_i32 = arith.constant 0 : i32
    return %arg0, %arg1 : i32, i32
  }
  func.func @transform_1(%arg0: i32, %arg1: i32) -> (i32, i32) {
    %c0_i32 = arith.constant 0 : i32
    %c0_i32_0 = arith.constant 0 : i32
    return %arg0, %c0_i32 : i32, i32
  }
  func.func @transform_2(%arg0: i32, %arg1: i32) -> (i32, i32) {
    %c0_i32 = arith.constant 0 : i32
    %c0_i32_0 = arith.constant 0 : i32
    return %arg0, %c0_i32 : i32, i32
  }
}

</mosaic_0001>

<bundles_post_ra>
// kernel: tpu_custom_call.1
= control target key start
LH: loop header
LB: loop body
LE: loop exit
PB: predicated region body
PF: predicated region fallthrough
CT: control target
= control target key end

     0   :  { %vm15_vm0 = vcmask 7168   ;;  %v97_v1 = vmov -inf   ;;  %v98_v2 = vmov 0   ;;  %v99_v3 = vmov 0.0   ;;  %s133_s0 = inlined_call_operand.vmem [shape: f32[8,128], index: 0, kind: input, shape index: {}]   ;;  %s134_s1 = inlined_call_operand.vmem [shape: s32[8,1], index: 1, kind: input, shape index: {}]   ;;  %s135_s2 = inlined_call_operand.vmem [shape: f32[8,1], index: 2, kind: output, shape index: {}]  }
   0x1   :  { %v20_v0 = vld [vmem:[%s133_s0] sm:$0xff]  ;;  %16 = vst.msk [vmem:[#allocation2] sm:$0xff] %vm15_vm0, %v97_v1  ;;  %89 = vset.pattern.permute.xlu0 %v98_v2  ;;  %90 = vset.pattern.permute.xlu1 %v98_v2  ;;  %17 = vst.msk [vmem:[#allocation3] sm:$0xff] %vm15_vm0, %v99_v3  ;;  %v23_v12 = vlaneseq }
   0x2   :  { %28 = vmax.xlane.f32.xlu0 %v20_v0  ;;  %18 = vst.msk [vmem:[#allocation4] sm:$0xff] %vm15_vm0, %v99_v3  ;;  %19 = vst.msk [vmem:[#allocation5] sm:$0xff] %vm15_vm0, %v99_v3  ;;  %v21_v4 = vld [vmem:[%s134_s1] sm:$0xff] }
   0x3   :  { %52 = vperm.xlu1 %90, %v21_v4   ;;  %v24_v13 = vand.u32 127, %v23_v12 }
   0x8   :  { %v27_v5 = vld [vmem:[#allocation2] sm:$0xff]  ;;  %v40_v19 = vld [vmem:[#allocation3] sm:$0xff] }
   0x9   :  { %v50_v23 = vld [vmem:[#allocation4] sm:$0xff]  ;;  %v62_v27 = vld [vmem:[#allocation5] sm:$0xff] }
  0x82   :  { %v53_v14 = vpop.permute.xlu1 %52 }
  0x83   :  { %vm54_vm1 = vcmp.eq.s32.totalorder %v24_v13, %v53_v14 }
  0x84   :  { %v55_v16 = vsel %vm54_vm1, %v20_v0, 0.0 }
  0x8f   :  { %v29_v6 = vpop.xlane.xlu0 %28 }
  0x90   :  { %v30_v7 = vmax.f32 %v27_v5, %v29_v6 }
  0x92   :  { %v37_v8 = vsub.f32 %v27_v5, %v30_v7  ;;  %49 = vst.msk [vmem:[#allocation2] sm:$0xff] %vm15_vm0, %v30_v7  ;;  %33 = vperm.xlu0 %89, %v30_v7   ;;  %v63_v26 = vmul.f32 128.0, %v30_v7 }
  0x94   :  { %v38_v17 = vmul.f32 1.442695, %v37_v8 }
  0x99   :  { %v70_v35 = vld [vmem:[#allocation2] sm:$0xff] }
 0x111   :  { %v34_v9 = vpop.permute.xlu0 %33 }
 0x112   :  { %v36_v10 = vsub.f32 %v20_v0, %v34_v9 }
 0x114   :  { %v42_v11 = vmul.f32 1.442695, %v36_v10 }
 0x116   :  { %91 = vpow2.f32 %v42_v11 }
 0x117   :  { %93 = vpow2.f32 %v38_v17 }
 0x120   :  { %v92_v15 = vpop.eup %91 }
 0x121   :  { %44 = vadd.xlane.f32.xlu1 %v92_v15  ;;  %v94_v18 = vpop.eup %93 }
 0x122   :  { %v41_v20 = vmul.f32 %v94_v18, %v40_v19 }
 0x125   :  { %56 = vadd.xlane.f32.xlu1 %v55_v16 }
 0x129   :  { %60 = vadd.xlane.f32.xlu1 %v36_v10 }
 0x1ae   :  { %v45_v21 = vpop.xlane.xlu1 %44 }
 0x1af   :  { %v46_v22 = vadd.f32 %v45_v21, %v41_v20 }
 0x1b1   :  { %48 = vst.msk [vmem:[#allocation3] sm:$0xff] %vm15_vm0, %v46_v22 }
 0x1b2   :  { %v57_v24 = vpop.xlane.xlu1 %56 }
 0x1b3   :  { %v58_v25 = vadd.f32 %v57_v24, %v50_v23 }
 0x1b5   :  { %59 = vst.msk [vmem:[#allocation4] sm:$0xff] %vm15_vm0, %v58_v25 }
 0x1b6   :  { %v61_v28 = vpop.xlane.xlu1 %60 }
 0x1b7   :  { %v64_v29 = vadd.f32 %v63_v26, %v61_v28 }
 0x1b8   :  { %v71_v30 = vld [vmem:[#allocation3] sm:$0xff] }
 0x1b9   :  { %95 = vlog2.f32 %v71_v30  ;;  %v65_v31 = vadd.f32 %v64_v29, %v62_v27 }
 0x1bb   :  { %66 = vst.msk [vmem:[#allocation5] sm:$0xff] %vm15_vm0, %v65_v31 }
 0x1bc   :  { %v75_v33 = vld [vmem:[#allocation4] sm:$0xff] }
 0x1bd   :  { %v76_v38 = vmul.f32 0.9, %v75_v33 }
 0x1c2   :  { %v78_v36 = vld [vmem:[#allocation5] sm:$0xff] }
 0x1c3   :  { %v96_v32 = vpop.eup %95  ;;  %v79_v40 = vmul.f32 0.00078125, %v78_v36 }
 0x1c4   :  { %v73_v34 = vmul.f32 0.6931472, %v96_v32 }
 0x1c6   :  { %v74_v37 = vadd.f32 %v73_v34, %v70_v35 }
 0x1c8   :  { %v77_v39 = vsub.f32 %v74_v37, %v76_v38 }
 0x1ca   :  { %v80_v41 = vsub.f32 %v77_v39, %v79_v40 }
 0x1cc   :  { %81 = vst.msk [vmem:[%s135_s2] sm:$0xff] %vm15_vm0, %v80_v41 }

</bundles_post_ra>
